<compile_context>
chip_gen: v5e
topology: v5e:2x2
jax: 0.10.0
libtpu: 0.0.40
codegen_flags: <defaults>
</compile_context>

<pallas_src>
import functools

import jax
import jax.numpy as jnp
from jax import lax
from jax.experimental import pallas as pl
from jax.experimental.pallas import tpu as pltpu


def _round_up(x: int, m: int) -> int:
    return ((x + m - 1) // m) * m


def _largest_divisor(total: int, candidates) -> int:
    for c in candidates:
        if total % c == 0:
            return c
    return candidates[-1]


def _physical_vmem_bytes() -> int:
    try:
        return int(pltpu.get_tpu_info().vmem_capacity_bytes)
    except Exception:
        return 64 << 20  # conservative default: v7x per-TensorCore VMEM


def _choose_tiles(B, Np, Kp, norm, in_bytes, tile_budget):
    m_align = 16 if in_bytes == 2 else 8
    if norm:
        # Exact training-mode batch statistics need the whole batch resident
        # in one M tile.
        # TODO(synk): two-stage (matmul+stats, then normalize) kernel for very
        # large batches with Norm=True instead of one whole-batch M tile.
        tm = _round_up(B, m_align)
    else:
        tm = min(_round_up(B, m_align), 512)
    Bp = _round_up(B, tm)

    tn = _largest_divisor(Np, (512, 256, 128))
    tk = _largest_divisor(Kp, (2048, 1024, 512, 256, 128))

    # v7x megacore: keep >= 2 'parallel' output tiles when N allows it.
    if (Bp // tm) * (Np // tn) < 2 and tn >= 256:
        tn //= 2

    def est(tm_, tn_, tk_):
        return (2 * in_bytes * (tm_ * tk_ + tk_ * tn_)   # double-buffered x, w
                + 2 * 4 * tm_ * tn_                      # f32 output block (acc)
                + 2 * 4 * 3 * tn_)                       # bias / gamma / beta rows

    while est(tm, tn, tk) > tile_budget and tk > 128:
        tk //= 2
    while est(tm, tn, tk) > tile_budget and tn > 128:
        tn //= 2
    while (not norm and est(tm, tn, tk) > tile_budget and tm > m_align
           and tm % (2 * m_align) == 0 and Bp % (tm // 2) == 0):
        tm //= 2

    return tm, tn, tk, Bp, est(tm, tn, tk)


def _make_kernel(activation: str, lrelu_val: float, norm: bool,
                 batch_real: int, eps: float = 1e-5):
    """Kernel body: K-last tiled matmul accumulated into the f32 output block,
    with a fused bias / BatchNorm / activation epilogue on the last K step."""

    def act(y):
        if activation == "relu":
            return jnp.maximum(y, 0.0)
        if activation == "lrelu":
            return jnp.where(y >= 0.0, y, y * lrelu_val)
        return y

    if norm:
        def kernel(x_ref, w_ref, b_ref, g_ref, be_ref, o_ref):
            k = pl.program_id(2)

            @pl.when(k == 0)
            def _():
                o_ref[...] = jnp.zeros_like(o_ref)

            # (tm, tk) @ (tk, tn) canonical contraction -> f32 accumulate.
            o_ref[...] += jnp.dot(x_ref[...], w_ref[...],
                                  preferred_element_type=jnp.float32)

            @pl.when(k == pl.num_programs(2) - 1)
            def _():
                y = o_ref[...] + b_ref[...]
                # BatchNorm1d training-mode stats over the real batch rows.
                # Two-pass: masked mean first, then centered variance.
                inv_b = jnp.float32(1.0 / batch_real)
                if y.shape[0] > batch_real:
                    rows = lax.broadcasted_iota(jnp.int32, y.shape, 0)
                    mask = (rows < batch_real).astype(jnp.float32)
                    mean = jnp.sum(y * mask, axis=0, keepdims=True) * inv_b
                    d = y - mean
                    dm = d * mask
                    var = jnp.sum(dm * dm, axis=0, keepdims=True) * inv_b
                else:
                    mean = jnp.sum(y, axis=0, keepdims=True) * inv_b
                    d = y - mean
                    var = jnp.sum(d * d, axis=0, keepdims=True) * inv_b
                y = d * lax.rsqrt(var + eps) * g_ref[...] + be_ref[...]
                o_ref[...] = act(y).astype(o_ref.dtype)

        return kernel

    def kernel(x_ref, w_ref, b_ref, o_ref):
        k = pl.program_id(2)

        @pl.when(k == 0)
        def _():
            o_ref[...] = jnp.zeros_like(o_ref)

        o_ref[...] += jnp.dot(x_ref[...], w_ref[...],
                              preferred_element_type=jnp.float32)

        @pl.when(k == pl.num_programs(2) - 1)
        def _():
            bvec = b_ref[...]
            rows = o_ref.shape[0]
            chunk = 256
            if rows > chunk and rows % chunk == 0:
                # Chunk the epilogue so the whole tm x tn tile never lives in
                # vregs at once (avoids spills when tiles are large).
                def body(c, carry):
                    r = pl.multiple_of(c * chunk, chunk)
                    o_ref[pl.ds(r, chunk), :] = act(
                        o_ref[pl.ds(r, chunk), :] + bvec).astype(o_ref.dtype)
                    return carry

                lax.fori_loop(0, rows // chunk, body, 0, unroll=True)
            else:
                o_ref[...] = act(o_ref[...] + bvec).astype(o_ref.dtype)

    return kernel


def prepare_linear_params(w, b, gamma=None, beta=None, *, use_bf16=False):
    """One-time parameter prep (do this OUTSIDE the training/inference step).

    w: (Dout, Din) PyTorch nn.Linear layout.
    Returns (wt, b2, g2, be2, dout) with wt = padded W^T of shape (Kp, Np),
    lane-dense multiples of 128, optionally cast to bf16; bias/gamma/beta as
    (1, Np) f32 rows for the fused epilogue.
    """
    Dout, Din = w.shape
    Kp = _round_up(Din, 128)
    Np = _round_up(Dout, 128)
    wt = jnp.pad(w.astype(jnp.float32),
                 ((0, Np - Dout), (0, Kp - Din))).T            # (Kp, Np)
    if use_bf16:
        wt = wt.astype(jnp.bfloat16)
    b2 = jnp.pad(b.astype(jnp.float32), (0, Np - Dout)).reshape(1, Np)
    g = (jnp.ones((Dout,), jnp.float32) if gamma is None
         else gamma.astype(jnp.float32))
    be = (jnp.zeros((Dout,), jnp.float32) if beta is None
          else beta.astype(jnp.float32))
    g2 = jnp.pad(g, (0, Np - Dout), constant_values=1.0).reshape(1, Np)
    be2 = jnp.pad(be, (0, Np - Dout)).reshape(1, Np)
    return wt, b2, g2, be2, Dout


@functools.partial(
    jax.jit,
    static_argnames=("dout", "activation", "lrelu_val", "norm", "use_bf16"))
def linear_apply(x, wt, b2, g2, be2, *, dout, activation="relu",
                 lrelu_val=0.2, norm=False, use_bf16=False):
    """Pallas forward with pre-prepared params: y = act(BN?(x @ W^T + b))."""
    B, Din = x.shape
    Kp, Np = wt.shape
    assert Din <= Kp and dout <= Np

    in_bytes = 2 if use_bf16 else 4
    phys_vmem = _physical_vmem_bytes()
    tile_budget = min(int(phys_vmem * 0.6), 48 << 20)

    tm, tn, tk, Bp, vmem_est = _choose_tiles(B, Np, Kp, norm, in_bytes,
                                             tile_budget)
    if norm and vmem_est > tile_budget:
        raise ValueError(
            "Batch too large for single-tile BatchNorm path on this chip "
            f"(needs ~{vmem_est >> 20} MiB VMEM). "
            "TODO(synk): two-stage stats kernel.")

    xp = x
    if Bp != B or Kp != Din:
        xp = jnp.pad(x, ((0, Bp - B), (0, Kp - Din)))
    if use_bf16:
        xp = xp.astype(jnp.bfloat16)

    grid = (Bp // tm, Np // tn, Kp // tk)
    grid_m, grid_n, _ = grid

    kernel = _make_kernel(activation, float(lrelu_val), norm, B)

    in_specs = [
        pl.BlockSpec((tm, tk), lambda i, j, k: (i, k)),   # x tile
        pl.BlockSpec((tk, tn), lambda i, j, k: (k, j)),   # W^T tile
        pl.BlockSpec((1, tn), lambda i, j, k: (0, j)),    # bias (K-resident)
    ]
    args = [xp, wt, b2]
    if norm:
        in_specs += [pl.BlockSpec((1, tn), lambda i, j, k: (0, j)),   # gamma
                     pl.BlockSpec((1, tn), lambda i, j, k: (0, j))]   # beta
        args += [g2, be2]

    cost = pl.CostEstimate(
        flops=2 * Bp * Kp * Np,
        transcendentals=0,
        bytes_accessed=(in_bytes * (Bp * Kp * grid_n + Kp * Np * grid_m)
                        + 4 * Bp * Np + 4 * 3 * Np * grid_m),
    )

    vmem_limit = int(min(int(phys_vmem * 0.85),
                         max(32 << 20, 2 * vmem_est)))

    out = pl.pallas_call(
        kernel,
        out_shape=jax.ShapeDtypeStruct((Bp, Np), jnp.float32),
        grid_spec=pltpu.PrefetchScalarGridSpec(
            num_scalar_prefetch=0,
            grid=grid,
            in_specs=in_specs,
            out_specs=pl.BlockSpec((tm, tn), lambda i, j, k: (i, j)),
        ),
        compiler_params=pltpu.CompilerParams(
            dimension_semantics=("parallel", "parallel", "arbitrary"),
            vmem_limit_bytes=vmem_limit,
        ),
        cost_estimate=cost,
    )(*args)

    out = out[:B, :dout]
    if out.dtype != x.dtype and x.dtype == jnp.float32:
        out = out.astype(x.dtype)
    return out


def linear_forward(x, w, b, gamma=None, beta=None, *, activation="relu",
                   lrelu_val=0.2, norm=False, use_bf16=False):
    """Convenience drop-in (re-prepares weights each call; prefer calling
    prepare_linear_params once and linear_apply in the hot path)."""
    wt, b2, g2, be2, dout = prepare_linear_params(
        w, b, gamma, beta, use_bf16=use_bf16)
    return linear_apply(x, wt, b2, g2, be2, dout=dout, activation=activation,
                        lrelu_val=lrelu_val, norm=norm, use_bf16=use_bf16)


if __name__ == "__main__":
    # Small shapes implied by the module: a plain fully-connected layer.
    B, Din, Dout = 8, 32, 64

    key = jax.random.PRNGKey(0)
    kx, kw, kb = jax.random.split(key, 3)

    # Mimic PyTorch's U(-1/sqrt(fan_in), 1/sqrt(fan_in)) init.
    bound = 1.0 / (Din ** 0.5)
    x = jax.random.normal(kx, (B, Din), dtype=jnp.float32)
    w = jax.random.uniform(kw, (Dout, Din), minval=-bound, maxval=bound,
                           dtype=jnp.float32)
    b = jax.random.uniform(kb, (Dout,), minval=-bound, maxval=bound,
                           dtype=jnp.float32)
    gamma = jnp.ones((Dout,), dtype=jnp.float32)   # BatchNorm1d weight
    beta = jnp.zeros((Dout,), dtype=jnp.float32)   # BatchNorm1d bias

    # One-time weight prep (transpose + pad) outside the per-call hot path.
    wt, b2, g2, be2, dout = prepare_linear_params(w, b, gamma, beta)

    # Default module config: Activation='relu', Norm=False.
    out = jax.block_until_ready(
        linear_apply(x, wt, b2, g2, be2, dout=dout, activation="relu",
                     norm=False))
    ref = jnp.maximum(x @ w.T + b, 0.0)
    assert out.shape == (B, Dout)
    assert jnp.allclose(out, ref, atol=1e-5, rtol=1e-5)

    # 'lrelu' + BatchNorm1d (training-mode batch stats) path.
    out2 = jax.block_until_ready(
        linear_apply(x, wt, b2, g2, be2, dout=dout, activation="lrelu",
                     lrelu_val=0.2, norm=True))
    y = x @ w.T + b
    m = y.mean(axis=0, keepdims=True)
    v = ((y - m) ** 2).mean(axis=0, keepdims=True)
    yn = (y - m) / jnp.sqrt(v + 1e-5) * gamma + beta
    ref2 = jnp.where(yn >= 0.0, yn, 0.2 * yn)
    assert jnp.allclose(out2, ref2, atol=1e-4, rtol=1e-4)

    # Optional bf16-MXU-operand path (f32 accumulation), looser tolerance.
    wt16, b216, g216, be216, _ = prepare_linear_params(w, b, gamma, beta,
                                                       use_bf16=True)
    out3 = jax.block_until_ready(
        linear_apply(x, wt16, b216, g216, be216, dout=dout, activation="relu",
                     norm=False, use_bf16=True))
    assert out3.shape == (B, Dout)
    assert jnp.allclose(out3, ref, atol=5e-2, rtol=5e-2)

    print("KERNEL_OK")
</pallas_src>

<mosaic_0001>
module attributes {stable_mosaic.version = 11 : i64} {
  func.func @kernel(%arg0: i32, %arg1: i32, %arg2: i32, %arg3: memref<8x128xf32, #tpu.memory_space<vmem>>, %arg4: memref<128x128xf32, #tpu.memory_space<vmem>>, %arg5: memref<1x128xf32, #tpu.memory_space<vmem>>, %arg6: memref<8x128xf32, #tpu.memory_space<vmem>>) attributes {dimension_semantics = [#tpu.dimension_semantics<parallel>, #tpu.dimension_semantics<parallel>, #tpu.dimension_semantics<arbitrary>], iteration_bounds = array<i64: 1, 1, 1>, scalar_prefetch = 0 : i64, scratch_operands = 0 : i64, tpu.core_type = #tpu.core_type<tc>, window_params = [{transform_indices = @transform_0, window_bounds = array<i64: 8, 128>}, {transform_indices = @transform_1, window_bounds = array<i64: 128, 128>}, {transform_indices = @transform_2, window_bounds = array<i64: 1, 128>}, {transform_indices = @transform_3, window_bounds = array<i64: 8, 128>}]} {
    %c0_i32 = arith.constant 0 : i32
    %0 = arith.cmpi eq, %arg2, %c0_i32 : i32
    %1 = arith.extui %0 : i1 to i32
    %c0_i32_0 = arith.constant 0 : i32
    %2 = arith.cmpi ne, %1, %c0_i32_0 : i32
    scf.if %2 {
      %cst_10 = arith.constant 0.000000e+00 : f32
      %12 = vector.broadcast %cst_10 : f32 to vector<8x128xf32>
      %c0_11 = arith.constant 0 : index
      %c0_12 = arith.constant 0 : index
      %13 = vector.load %arg6[%c0_11, %c0_12] : memref<8x128xf32, #tpu.memory_space<vmem>>, vector<8x128xf32>
      tpu.vector_store %arg6[%c0_11, %c0_12], %12 {strides = array<i32>} : memref<8x128xf32, #tpu.memory_space<vmem>>, vector<8x128xf32>,
    } else {
    }
    %c0 = arith.constant 0 : index
    %c0_1 = arith.constant 0 : index
    %3 = vector.load %arg6[%c0, %c0_1] : memref<8x128xf32, #tpu.memory_space<vmem>>, vector<8x128xf32>
    %c0_2 = arith.constant 0 : index
    %c0_3 = arith.constant 0 : index
    %4 = vector.load %arg3[%c0_2, %c0_3] : memref<8x128xf32, #tpu.memory_space<vmem>>, vector<8x128xf32>
    %c0_4 = arith.constant 0 : index
    %c0_5 = arith.constant 0 : index
    %5 = vector.load %arg4[%c0_4, %c0_5] : memref<128x128xf32, #tpu.memory_space<vmem>>, vector<128x128xf32>
    %cst = arith.constant dense<0.000000e+00> : vector<8x128xf32>
    %6 = tpu.matmul %4, %5, %cst {dimension_numbers = #tpu.dot_dimension_numbers<[1], [0], [0], [1], [0, 0, 1, 1], [], []>} : vector<8x128xf32>, vector<128x128xf32>, vector<8x128xf32> -> vector<8x128xf32>
    %7 = arith.addf %3, %6 : vector<8x128xf32>
    %c0_6 = arith.constant 0 : index
    %c0_7 = arith.constant 0 : index
    %8 = vector.load %arg6[%c0_6, %c0_7] : memref<8x128xf32, #tpu.memory_space<vmem>>, vector<8x128xf32>
    tpu.vector_store %arg6[%c0_6, %c0_7], %7 {strides = array<i32>} : memref<8x128xf32, #tpu.memory_space<vmem>>, vector<8x128xf32>,
    %c0_i32_8 = arith.constant 0 : i32
    %9 = arith.cmpi eq, %arg2, %c0_i32_8 : i32
    %10 = arith.extui %9 : i1 to i32
    %c0_i32_9 = arith.constant 0 : i32
    %11 = arith.cmpi ne, %10, %c0_i32_9 : i32
    scf.if %11 {
      %c0_10 = arith.constant 0 : index
      %c0_11 = arith.constant 0 : index
      %12 = vector.load %arg5[%c0_10, %c0_11] : memref<1x128xf32, #tpu.memory_space<vmem>>, vector<1x128xf32>
      %c0_12 = arith.constant 0 : index
      %c0_13 = arith.constant 0 : index
      %13 = vector.load %arg6[%c0_12, %c0_13] : memref<8x128xf32, #tpu.memory_space<vmem>>, vector<8x128xf32>
      %14 = vector.broadcast %12 : vector<1x128xf32> to vector<8x128xf32>
      %15 = arith.addf %13, %14 : vector<8x128xf32>
      %cst_14 = arith.constant 0.000000e+00 : f32
      %16 = vector.broadcast %cst_14 : f32 to vector<8x128xf32>
      %17 = arith.maximumf %15, %16 : vector<8x128xf32>
      %c0_15 = arith.constant 0 : index
      %c0_16 = arith.constant 0 : index
      %18 = vector.load %arg6[%c0_15, %c0_16] : memref<8x128xf32, #tpu.memory_space<vmem>>, vector<8x128xf32>
      tpu.vector_store %arg6[%c0_15, %c0_16], %17 {strides = array<i32>} : memref<8x128xf32, #tpu.memory_space<vmem>>, vector<8x128xf32>,
    } else {
    }
    return
  }
  func.func @transform_0(%arg0: i32, %arg1: i32, %arg2: i32) -> (i32, i32) {
    %c0_i32 = arith.constant 0 : i32
    return %arg0, %arg2 : i32, i32
  }
  func.func @transform_1(%arg0: i32, %arg1: i32, %arg2: i32) -> (i32, i32) {
    %c0_i32 = arith.constant 0 : i32
    return %arg2, %arg1 : i32, i32
  }
  func.func @transform_2(%arg0: i32, %arg1: i32, %arg2: i32) -> (i32, i32) {
    %c0_i32 = arith.constant 0 : i32
    %c0_i32_0 = arith.constant 0 : i32
    return %c0_i32, %arg1 : i32, i32
  }
  func.func @transform_3(%arg0: i32, %arg1: i32, %arg2: i32) -> (i32, i32) {
    %c0_i32 = arith.constant 0 : i32
    return %arg0, %arg1 : i32, i32
  }
}

</mosaic_0001>

<bundles_post_ra>
// kernel: linear_apply.1
= control target key start
LH: loop header
LB: loop body
LE: loop exit
PB: predicated region body
PF: predicated region fallthrough
CT: control target
= control target key end

     0   :  { %8 = vsyncpa [#allocation3], 0  ;;  %s198_s0 = inlined_call_operand.vmem [shape: f32[8,128], index: 0, kind: input, shape index: {}]   ;;  %s199_s1 = inlined_call_operand.hbm [shape: f32[128,128], index: 1, kind: input, shape index: {}]   ;;  %s200_s2 = inlined_call_operand.vmem [shape: f32[1,128], index: 2, kind: input, shape index: {}]   ;;  %s201_s3 = inlined_call_operand.hbm [shape: f32[8,128], index: 3, kind: output, shape index: {}]  }
   0x1   :  { %9 = vsyncpa [#allocation4], 0  ;;  %s16_s14 = sshll.u32 %s199_s1, 4  ;;  %s162_s15 = smov [#allocation2]   ;;  %s17_s14 = int_to_ptr.hbm [resolvable:$true] %s16_s14 }
   0x2   :  { %s18_s16 = sshll.u32 %s162_s15, 4  ;;  %s163_s17 = smov 128   ;;  %s19_s16 = int_to_ptr.vmem [resolvable:$true] %s18_s16 }
   0x3   :  { %s164_s18 = smov 8  }
   0x4   :  { %24 = dma.hbm_to_vmem [thread:$0]  %s17_s14, 2048, %s19_s16, [#allocation3], %s163_s17, %s163_s17, %s164_s18  }
   0x5   :  { %158 = dma.done.wait [#allocation3], 2048  }
   0x6   :  { %159 = vsyncadd [#allocation3], 4294965248  ;;  %v53_v0 = vld [vmem:[#allocation2 + $0x78] sm:$0xff]  ;;  %v52_v1 = vld [vmem:[#allocation2 + $0x70] sm:$0xff]  ;;  %s165_s22 = smov [#allocation5]   ;;  %s94_s26 = sshll.u32 %s201_s3, 4  ;;  %s95_s26 = int_to_ptr.hbm [resolvable:$true] %s94_s26 }
   0x7   :  { %54 = vmatpush.msra.mxu0 %v53_v0  ;;  %v51_v2 = vld [vmem:[#allocation2 + $0x68] sm:$0xff]  ;;  %v50_v3 = vld [vmem:[#allocation2 + $0x60] sm:$0xff]  ;;  %v49_v4 = vld [vmem:[#allocation2 + $0x58] sm:$0xff]  ;;  %s92_s23 = sshll.u32 %s165_s22, 4  ;;  %s93_s23 = int_to_ptr.vmem [resolvable:$true] %s92_s23 }
   0x8   :  { %v48_v5 = vld [vmem:[#allocation2 + $0x50] sm:$0xff]  ;;  %v47_v6 = vld [vmem:[#allocation2 + $0x48] sm:$0xff]  ;;  %v46_v7 = vld [vmem:[#allocation2 + $0x40] sm:$0xff] }
   0x9   :  { %55 = vmatpush.msra.mxu0 %v52_v1  ;;  %v45_v8 = vld [vmem:[#allocation2 + $0x38] sm:$0xff]  ;;  %v44_v9 = vld [vmem:[#allocation2 + $0x30] sm:$0xff]  ;;  %v43_v10 = vld [vmem:[#allocation2 + $0x28] sm:$0xff] }
   0xa   :  { %v42_v11 = vld [vmem:[#allocation2 + $0x20] sm:$0xff]  ;;  %v41_v12 = vld [vmem:[#allocation2 + $0x18] sm:$0xff]  ;;  %v40_v13 = vld [vmem:[#allocation2 + $0x10] sm:$0xff] }
   0xb   :  { %56 = vmatpush.msra.mxu0 %v51_v2  ;;  %v39_v14 = vld [vmem:[#allocation2 + $0x8] sm:$0xff]  ;;  %v38_v15 = vld [vmem:[#allocation2] sm:$0xff] }
   0xc   :  { %v37_v16 = vld [vmem:[%s198_s0] sm:$0xff] }
   0xd   :  { %57 = vmatpush.msra.mxu0 %v50_v3  ;;  %v109_v17 = vld [vmem:[%s200_s2] ss:$0 sm:$0xff] }
   0xf   :  { %58 = vmatpush.msra.mxu0 %v49_v4 }
  0x11   :  { %59 = vmatpush.msra.mxu0 %v48_v5 }
  0x13   :  { %60 = vmatpush.msra.mxu0 %v47_v6 }
  0x15   :  { %61 = vmatpush.msra.mxu0 %v46_v7 }
  0x17   :  { %62 = vmatpush.msra.mxu0 %v45_v8 }
  0x19   :  { %63 = vmatpush.msra.mxu0 %v44_v9 }
  0x1b   :  { %64 = vmatpush.msra.mxu0 %v43_v10 }
  0x1d   :  { %65 = vmatpush.msra.mxu0 %v42_v11 }
  0x1f   :  { %66 = vmatpush.msra.mxu0 %v41_v12 }
  0x21   :  { %67 = vmatpush.msra.mxu0 %v40_v13 }
  0x23   :  { %68 = vmatpush.msra.mxu0 %v39_v14 }
  0x25   :  { %69 = vmatpush.msra.mxu0 %v38_v15 }
  0x26   :  { %70 = vmatmul.f32.vlgmr.msra.gmra.mxu0 %v37_v16 }
  0xa3   :  { %v71_v18 = vpop.f32.mrf.mxu0 }
  0xa4   :  { %v84_v19 = vadd.f32 %v109_v17, %v71_v18 }
  0xa6   :  { %v85_v20 = vmax.f32 %v84_v19, 0.0 }
  0xa8   :  { %86 = vst [vmem:[#allocation5] sm:$0xff] %v85_v20 }
  0xa9   :  { %97 = dma.vmem_to_hbm [thread:$0]  %s93_s23, 128, %s95_s26, [#allocation4]  }
  0xaa   :  { %160 = dma.done.wait [#allocation4], 128  }
  0xab   :  { %161 = vsyncadd [#allocation4], 4294967168 }
  0xac   :  { %102 = vsyncpa [#allocation3], 1 }
  0xad   :  { %103 = vsyncpa [#allocation4], 1 }

</bundles_post_ra>
